<compile_context>
chip_gen: v7x
topology: tpu7x:2x2x1
jax: 0.10.0
libtpu: 0.0.40
codegen_flags: <defaults>
</compile_context>

<pallas_src>
import jax
import jax.numpy as jnp
from jax.experimental import pallas as pl
from jax.experimental.pallas import tpu as pltpu

_SUBLANE = 8
_LANE = 128


def _adv_loss_kernel(crash_ref, x_ref, xb_ref, wfa_ref, agent_ref, out_ref):
    # crash_ref : SMEM [1] int32 (scalar-prefetch; consumed only by the agent index_map)
    # x_ref     : VMEM [1, T, 6]  input dtype (this sample's trajectory)
    # xb_ref    : VMEM [1, T, 6]  input dtype (this sample's baseline)
    # wfa_ref   : SMEM [3, 3]     f32
    # agent_ref : VMEM [1, T, C]  input dtype (crash agent's trajectory block only)
    # out_ref   : VMEM [1, 8, 128] f32 (lane-dense tile; loss broadcast -> unmasked vst)
    del crash_ref

    # Hoist the six SMEM scalar reads once; the scalar core does the addressing work.
    r00 = wfa_ref[0, 0]; r01 = wfa_ref[0, 1]; t0 = wfa_ref[0, 2]
    r10 = wfa_ref[1, 0]; r11 = wfa_ref[1, 1]; t1 = wfa_ref[1, 2]

    x = x_ref[0].astype(jnp.float32)      # [T, 6]  (cast in-kernel, not in the wrapper)
    xb = xb_ref[0].astype(jnp.float32)    # [T, 6]
    ag = agent_ref[0]                     # [T, C]

    px = x[:, 0:1]                        # [T, 1]
    py = x[:, 1:2]                        # [T, 1]

    # transform_agents_to_world on positions: pos_global = R @ pos + t  (VPU, not MXU)
    gx = px * r00 + py * r01 + t0
    gy = px * r10 + py * r11 + t1

    dx = gx - ag[:, 0:1].astype(jnp.float32)
    dy = gy - ag[:, 1:2].astype(jnp.float32)
    dist_sq = dx * dx + dy * dy           # [T, 1]
    dist = jnp.sqrt(dist_sq)              # [T, 1] == torch.norm(ego - crash, dim=-1)

    # softmin(dist) == softmax(-dist), numerically stabilized.  Exact divide: only one
    # normalizer element exists, so the approx EUP reciprocal has no benefit.
    neg = -dist
    m = jnp.max(neg, axis=(0, 1), keepdims=True)             # (1, 1)
    e = jnp.exp(neg - m)                                      # [T, 1]
    denom = jnp.sum(e, axis=(0, 1), keepdims=True)            # (1, 1)
    num = jnp.sum(dist_sq * e, axis=(0, 1), keepdims=True)    # (1, 1)
    adv = -(num / denom)                                      # (1, 1)

    # normal term: single masked pass selecting feature lanes {0, 1, 3}.
    d = x - xb                                                # [T, 6]
    col = jax.lax.broadcasted_iota(jnp.int32, d.shape, 1)
    keep = (col < 2) | (col == 3)
    sq = jnp.where(keep, d * d, 0.0)
    normal = jnp.sum(sq, axis=(0, 1), keepdims=True)          # (1, 1)

    total = adv + 0.5 * normal                                # (1, 1)
    # Lane-dense, full-tile (8,128) store -> unmasked vst; wrapper reads [b, 0, 0].
    out_ref[...] = jnp.broadcast_to(total.reshape(1, 1, 1), out_ref.shape)


def adversarial_loss_batched(x, x_baseline, world_from_agent, other_agent_traj,
                             crash_agent, sol_min_t=0):
    """x, x_baseline: [B, T, 6] (any float dtype, passed untouched);
    world_from_agent: [1, 3, 3] or [3, 3]; other_agent_traj: [N, T, C>=2] (untouched,
    only the crash block is DMA'd); crash_agent: scalar int (shared across the batch,
    clamped to [0, N-1] inside the index_map). Returns per-sample losses [B] f32."""
    assert sol_min_t == 0  # TODO(synk): nonzero sol_min_t needs a pl.ds over the T axis.
    B, T, F = x.shape
    assert x_baseline.shape == (B, T, F)
    N, _, C = other_agent_traj.shape

    wfa = jnp.asarray(world_from_agent, jnp.float32).reshape(3, 3)   # 9 scalars -> SMEM
    # crash_agent goes straight through scalar prefetch (a Python int becomes a baked
    # constant); the OOB clamp lives in the index_map, not as a wrapper HLO.
    crash = jnp.asarray(crash_agent, dtype=jnp.int32).reshape((1,))

    def agent_index_map(b, crash_ref):
        c = jnp.minimum(jnp.maximum(crash_ref[0], 0), N - 1)
        return (c, 0, 0)

    out = pl.pallas_call(
        _adv_loss_kernel,
        out_shape=jax.ShapeDtypeStruct((B, _SUBLANE, _LANE), jnp.float32),
        grid_spec=pltpu.PrefetchScalarGridSpec(
            num_scalar_prefetch=1,
            grid=(B,),
            in_specs=[
                pl.BlockSpec((1, T, F), lambda b, crash: (b, 0, 0)),
                pl.BlockSpec((1, T, F), lambda b, crash: (b, 0, 0)),
                pl.BlockSpec(memory_space=pltpu.MemorySpace.SMEM),
                pl.BlockSpec((1, T, C), agent_index_map),
            ],
            out_specs=pl.BlockSpec((1, _SUBLANE, _LANE), lambda b, crash: (b, 0, 0)),
        ),
        compiler_params=pltpu.CompilerParams(dimension_semantics=("parallel",)),
    )(crash, x, x_baseline, wfa, other_agent_traj)
    return out[:, 0, 0]


def adversarial_loss(x, x_baseline, world_from_agent, other_agent_traj, crash_agent,
                     sol_min_t=0):
    """Torch-module-equivalent forward: x [1, T, 6] -> scalar loss."""
    losses = adversarial_loss_batched(x, x_baseline, world_from_agent,
                                      other_agent_traj, crash_agent, sol_min_t)
    return losses[0]


def _reference(x, x_baseline, world_from_agent, other_agent_traj, crash_agent,
               sol_min_t=0):
    pos = x[0, :, :2]
    wfa = world_from_agent.reshape(3, 3)
    R, t = wfa[:2, :2], wfa[:2, 2]
    pos_g = pos @ R.T + t
    ego = pos_g[sol_min_t:]
    crash_pos = other_agent_traj[crash_agent, sol_min_t:, :2]
    dist = jnp.linalg.norm(ego - crash_pos, axis=-1)
    w = jax.nn.softmax(-dist)                                # softmin
    adv = -jnp.sum(dist ** 2 * w)
    dpos = x[0, :, :2] - x_baseline[0, :, :2]
    dyaw = x[0, :, 3] - x_baseline[0, :, 3]
    normal = jnp.sum(jnp.sum(dpos ** 2, axis=-1)) + jnp.sum(dyaw ** 2)
    return adv + 0.5 * normal


if __name__ == "__main__":
    key = jax.random.PRNGKey(0)
    B, T, N, C = 8, 16, 8, 3
    k1, k2, k3 = jax.random.split(key, 3)

    x_all = jax.random.normal(k1, (B, T, 6), dtype=jnp.float32)
    xb_all = x_all + 0.1 * jax.random.normal(k2, (B, T, 6), dtype=jnp.float32)

    theta = 0.3
    c, s = jnp.cos(theta), jnp.sin(theta)
    world_from_agent = jnp.array(
        [[[c, -s, 1.5], [s, c, -2.0], [0.0, 0.0, 1.0]]], dtype=jnp.float32)

    other_agent_traj = 2.0 * jax.random.normal(k3, (N, T, C), dtype=jnp.float32)
    crash_agent = 2

    # Single-sample path (matches the torch module's 1 x T x 6 forward).
    out1 = adversarial_loss(x_all[:1], xb_all[:1], world_from_agent,
                            other_agent_traj, crash_agent)
    out1 = jax.block_until_ready(out1)
    ref1 = _reference(x_all[:1], xb_all[:1], world_from_agent,
                      other_agent_traj, crash_agent)
    assert jnp.allclose(out1, ref1, rtol=1e-4, atol=1e-4), (float(out1), float(ref1))

    # Batched path (B candidate trajectories per call, parallel grid axis).
    outB = adversarial_loss_batched(x_all, xb_all, world_from_agent,
                                    other_agent_traj, crash_agent)
    outB = jax.block_until_ready(outB)
    refB = jnp.stack([_reference(x_all[b:b + 1], xb_all[b:b + 1], world_from_agent,
                                 other_agent_traj, crash_agent) for b in range(B)])
    assert jnp.allclose(outB, refB, rtol=1e-4, atol=1e-4), (outB, refB)

    print("KERNEL_OK")
</pallas_src>

<mosaic_0001>
module attributes {stable_mosaic.version = 11 : i64} {
  func.func @_adv_loss_kernel(%arg0: i32, %arg1: memref<1xi32, #tpu.memory_space<smem>>, %arg2: memref<1x16x6xf32, #tpu.memory_space<vmem>>, %arg3: memref<1x16x6xf32, #tpu.memory_space<vmem>>, %arg4: memref<3x3xf32, #tpu.memory_space<smem>>, %arg5: memref<1x16x3xf32, #tpu.memory_space<vmem>>, %arg6: memref<1x8x128xf32, #tpu.memory_space<vmem>>) attributes {dimension_semantics = [#tpu.dimension_semantics<parallel>], iteration_bounds = array<i64: 1>, scalar_prefetch = 1 : i64, scratch_operands = 0 : i64, tpu.core_type = #tpu.core_type<tc>, window_params = [{transform_indices = @transform_0, window_bounds = array<i64: 1, 16, 6>}, {transform_indices = @transform_1, window_bounds = array<i64: 1, 16, 6>}, {transform_indices = @transform_2, window_bounds = array<i64: 3, 3>}, {transform_indices = @transform_3, window_bounds = array<i64: 1, 16, 3>}, {transform_indices = @transform_4, window_bounds = array<i64: 1, 8, 128>}]} {
    %c0 = arith.constant 0 : index
    %c0_0 = arith.constant 0 : index
    %0 = memref.load %arg4[%c0, %c0_0] : memref<3x3xf32, #tpu.memory_space<smem>>
    %c0_1 = arith.constant 0 : index
    %c1 = arith.constant 1 : index
    %1 = memref.load %arg4[%c0_1, %c1] : memref<3x3xf32, #tpu.memory_space<smem>>
    %c0_2 = arith.constant 0 : index
    %c2 = arith.constant 2 : index
    %2 = memref.load %arg4[%c0_2, %c2] : memref<3x3xf32, #tpu.memory_space<smem>>
    %c1_3 = arith.constant 1 : index
    %c0_4 = arith.constant 0 : index
    %3 = memref.load %arg4[%c1_3, %c0_4] : memref<3x3xf32, #tpu.memory_space<smem>>
    %c1_5 = arith.constant 1 : index
    %c1_6 = arith.constant 1 : index
    %4 = memref.load %arg4[%c1_5, %c1_6] : memref<3x3xf32, #tpu.memory_space<smem>>
    %c1_7 = arith.constant 1 : index
    %c2_8 = arith.constant 2 : index
    %5 = memref.load %arg4[%c1_7, %c2_8] : memref<3x3xf32, #tpu.memory_space<smem>>
    %c0_9 = arith.constant 0 : index
    %c0_10 = arith.constant 0 : index
    %c0_11 = arith.constant 0 : index
    %6 = vector.load %arg2[%c0_9, %c0_10, %c0_11] : memref<1x16x6xf32, #tpu.memory_space<vmem>>, vector<1x16x6xf32>
    %7 = vector.shape_cast %6 : vector<1x16x6xf32> to vector<16x6xf32>
    %c0_12 = arith.constant 0 : index
    %c0_13 = arith.constant 0 : index
    %c0_14 = arith.constant 0 : index
    %8 = vector.load %arg3[%c0_12, %c0_13, %c0_14] : memref<1x16x6xf32, #tpu.memory_space<vmem>>, vector<1x16x6xf32>
    %9 = vector.shape_cast %8 : vector<1x16x6xf32> to vector<16x6xf32>
    %c0_15 = arith.constant 0 : index
    %c0_16 = arith.constant 0 : index
    %c0_17 = arith.constant 0 : index
    %10 = vector.load %arg5[%c0_15, %c0_16, %c0_17] : memref<1x16x3xf32, #tpu.memory_space<vmem>>, vector<1x16x3xf32>
    %11 = vector.shape_cast %10 : vector<1x16x3xf32> to vector<16x3xf32>
    %12 = vector.extract_strided_slice %7 {offsets = [0, 0], sizes = [16, 1], strides = [1, 1]} : vector<16x6xf32> to vector<16x1xf32>
    %13 = vector.extract_strided_slice %7 {offsets = [0, 1], sizes = [16, 1], strides = [1, 1]} : vector<16x6xf32> to vector<16x1xf32>
    %14 = vector.broadcast %0 : f32 to vector<16x1xf32>
    %15 = arith.mulf %12, %14 : vector<16x1xf32>
    %16 = vector.broadcast %1 : f32 to vector<16x1xf32>
    %17 = arith.mulf %13, %16 : vector<16x1xf32>
    %18 = arith.addf %15, %17 : vector<16x1xf32>
    %19 = vector.broadcast %2 : f32 to vector<16x1xf32>
    %20 = arith.addf %18, %19 : vector<16x1xf32>
    %21 = vector.broadcast %3 : f32 to vector<16x1xf32>
    %22 = arith.mulf %12, %21 : vector<16x1xf32>
    %23 = vector.broadcast %4 : f32 to vector<16x1xf32>
    %24 = arith.mulf %13, %23 : vector<16x1xf32>
    %25 = arith.addf %22, %24 : vector<16x1xf32>
    %26 = vector.broadcast %5 : f32 to vector<16x1xf32>
    %27 = arith.addf %25, %26 : vector<16x1xf32>
    %28 = vector.extract_strided_slice %11 {offsets = [0, 0], sizes = [16, 1], strides = [1, 1]} : vector<16x3xf32> to vector<16x1xf32>
    %29 = arith.subf %20, %28 : vector<16x1xf32>
    %30 = vector.extract_strided_slice %11 {offsets = [0, 1], sizes = [16, 1], strides = [1, 1]} : vector<16x3xf32> to vector<16x1xf32>
    %31 = arith.subf %27, %30 : vector<16x1xf32>
    %32 = arith.mulf %29, %29 : vector<16x1xf32>
    %33 = arith.mulf %31, %31 : vector<16x1xf32>
    %34 = arith.addf %32, %33 : vector<16x1xf32>
    %35 = math.sqrt %34 : vector<16x1xf32>
    %cst = arith.constant 0.000000e+00 : f32
    %36 = vector.broadcast %cst : f32 to vector<16x1xf32>
    %37 = arith.subf %36, %35 : vector<16x1xf32>
    %38 = vector.shape_cast %37 : vector<16x1xf32> to vector<1x16x1xf32>
    %cst_18 = arith.constant dense<0xFF800000> : vector<1xf32>
    %39 = vector.multi_reduction <maximumf>, %38, %cst_18 [1, 2] : vector<1x16x1xf32> to vector<1xf32>
    %40 = vector.shape_cast %39 : vector<1xf32> to vector<1x1x1xf32>
    %41 = vector.extract %40[0, 0, 0] : f32 from vector<1x1x1xf32>
    %42 = vector.broadcast %41 : f32 to vector<1x1xf32>
    %43 = vector.broadcast %42 : vector<1x1xf32> to vector<16x1xf32>
    %44 = arith.subf %37, %43 : vector<16x1xf32>
    %45 = math.exp %44 : vector<16x1xf32>
    %46 = vector.shape_cast %45 : vector<16x1xf32> to vector<1x16x1xf32>
    %cst_19 = arith.constant dense<0.000000e+00> : vector<1xf32>
    %47 = vector.multi_reduction <add>, %46, %cst_19 [1, 2] : vector<1x16x1xf32> to vector<1xf32>
    %48 = vector.shape_cast %47 : vector<1xf32> to vector<1x1x1xf32>
    %49 = vector.extract %48[0, 0, 0] : f32 from vector<1x1x1xf32>
    %50 = vector.broadcast %49 : f32 to vector<1x1xf32>
    %51 = arith.mulf %34, %45 : vector<16x1xf32>
    %52 = vector.shape_cast %51 : vector<16x1xf32> to vector<1x16x1xf32>
    %cst_20 = arith.constant dense<0.000000e+00> : vector<1xf32>
    %53 = vector.multi_reduction <add>, %52, %cst_20 [1, 2] : vector<1x16x1xf32> to vector<1xf32>
    %54 = vector.shape_cast %53 : vector<1xf32> to vector<1x1x1xf32>
    %55 = vector.extract %54[0, 0, 0] : f32 from vector<1x1x1xf32>
    %56 = vector.broadcast %55 : f32 to vector<1x1xf32>
    %57 = arith.divf %56, %50 : vector<1x1xf32>
    %cst_21 = arith.constant 0.000000e+00 : f32
    %58 = vector.broadcast %cst_21 : f32 to vector<1x1xf32>
    %59 = arith.subf %58, %57 : vector<1x1xf32>
    %60 = arith.subf %7, %9 : vector<16x6xf32>
    %61 = tpu.iota {dimensions = array<i32: 1>} : vector<16x6xi32>
    %c2_i32 = arith.constant 2 : i32
    %62 = vector.broadcast %c2_i32 : i32 to vector<16x6xi32>
    %63 = arith.cmpi slt, %61, %62 : vector<16x6xi32>
    %c3_i32 = arith.constant 3 : i32
    %64 = vector.broadcast %c3_i32 : i32 to vector<16x6xi32>
    %65 = arith.cmpi eq, %61, %64 : vector<16x6xi32>
    %66 = arith.ori %63, %65 : vector<16x6xi1>
    %67 = arith.mulf %60, %60 : vector<16x6xf32>
    %cst_22 = arith.constant 0.000000e+00 : f32
    %68 = vector.broadcast %cst_22 : f32 to vector<16x6xf32>
    %69 = arith.select %66, %67, %68 : vector<16x6xi1>, vector<16x6xf32>
    %70 = vector.shape_cast %69 : vector<16x6xf32> to vector<1x16x6xf32>
    %cst_23 = arith.constant dense<0.000000e+00> : vector<1xf32>
    %71 = vector.multi_reduction <add>, %70, %cst_23 [1, 2] : vector<1x16x6xf32> to vector<1xf32>
    %72 = vector.shape_cast %71 : vector<1xf32> to vector<1x1x1xf32>
    %73 = vector.extract %72[0, 0, 0] : f32 from vector<1x1x1xf32>
    %74 = vector.broadcast %73 : f32 to vector<1x1xf32>
    %cst_24 = arith.constant 5.000000e-01 : f32
    %75 = vector.broadcast %cst_24 : f32 to vector<1x1xf32>
    %76 = arith.mulf %75, %74 : vector<1x1xf32>
    %77 = arith.addf %59, %76 : vector<1x1xf32>
    %78 = vector.shape_cast %77 : vector<1x1xf32> to vector<1x1x1xf32>
    %79 = vector.shape_cast %78 : vector<1x1x1xf32> to vector<1x1x1xf32>
    %80 = vector.broadcast %79 : vector<1x1x1xf32> to vector<1x8x128xf32>
    %c0_25 = arith.constant 0 : index
    %c0_26 = arith.constant 0 : index
    %c0_27 = arith.constant 0 : index
    %81 = vector.load %arg6[%c0_25, %c0_26, %c0_27] : memref<1x8x128xf32, #tpu.memory_space<vmem>>, vector<1x8x128xf32>
    tpu.vector_store %arg6[%c0_25, %c0_26, %c0_27], %80 {strides = array<i32>} : memref<1x8x128xf32, #tpu.memory_space<vmem>>, vector<1x8x128xf32>,
    return
  }
  func.func @transform_0(%arg0: i32, %arg1: memref<1xi32, #tpu.memory_space<smem>>) -> (i32, i32, i32) {
    %c0_i32 = arith.constant 0 : i32
    %c0_i32_0 = arith.constant 0 : i32
    %c0_i32_1 = arith.constant 0 : i32
    return %arg0, %c0_i32, %c0_i32_0 : i32, i32, i32
  }
  func.func @transform_1(%arg0: i32, %arg1: memref<1xi32, #tpu.memory_space<smem>>) -> (i32, i32, i32) {
    %c0_i32 = arith.constant 0 : i32
    %c0_i32_0 = arith.constant 0 : i32
    %c0_i32_1 = arith.constant 0 : i32
    return %arg0, %c0_i32, %c0_i32_0 : i32, i32, i32
  }
  func.func @transform_2(%arg0: i32, %arg1: memref<1xi32, #tpu.memory_space<smem>>) -> (i32, i32) {
    %c0_i32 = arith.constant 0 : i32
    %c0_i32_0 = arith.constant 0 : i32
    %c0_i32_1 = arith.constant 0 : i32
    return %c0_i32, %c0_i32_0 : i32, i32
  }
  func.func @transform_3(%arg0: i32, %arg1: memref<1xi32, #tpu.memory_space<smem>>) -> (i32, i32, i32) {
    %c0 = arith.constant 0 : index
    %0 = memref.load %arg1[%c0] : memref<1xi32, #tpu.memory_space<smem>>
    %c0_i32 = arith.constant 0 : i32
    %1 = arith.maxsi %0, %c0_i32 : i32
    %c7_i32 = arith.constant 7 : i32
    %2 = arith.minsi %1, %c7_i32 : i32
    %c0_i32_0 = arith.constant 0 : i32
    %c0_i32_1 = arith.constant 0 : i32
    %c0_i32_2 = arith.constant 0 : i32
    return %2, %c0_i32_0, %c0_i32_1 : i32, i32, i32
  }
  func.func @transform_4(%arg0: i32, %arg1: memref<1xi32, #tpu.memory_space<smem>>) -> (i32, i32, i32) {
    %c0_i32 = arith.constant 0 : i32
    %c0_i32_0 = arith.constant 0 : i32
    %c0_i32_1 = arith.constant 0 : i32
    return %arg0, %c0_i32, %c0_i32_0 : i32, i32, i32
  }
}

</mosaic_0001>

<bundles_post_ra>
// kernel: tpu_custom_call.1
= control target key start
LH: loop header
LB: loop body
LE: loop exit
PB: predicated region body
PF: predicated region fallthrough
CT: control target
= control target key end

     0   :  { %11 = vsyncpa [#allocation6], 0  ;;  %s423_s0 = inlined_call_operand.<no memory space> [shape: s32[1], index: 0, kind: input, shape index: {}]   ;;  %s424_s1 = inlined_call_operand.vmem [shape: f32[1,16,6], index: 1, kind: input, shape index: {}]   ;;  %s425_s2 = inlined_call_operand.vmem [shape: f32[1,16,6], index: 2, kind: input, shape index: {}]   ;;  %s426_s3 = inlined_call_operand.vmem [shape: f32[3,3], index: 3, kind: input, shape index: {}]   ;;  %s427_s4 = inlined_call_operand.vmem [shape: f32[8,16,3], index: 4, kind: input, shape index: {}]   ;;  %s428_s5 = inlined_call_operand.hbm [shape: f32[1,8,128], index: 5, kind: output, shape index: {}]  }
   0x1   :  { %12 = vsyncpa [#allocation5], 0  ;;  %s23_s20 = sshll.u32 %s426_s3, 4  ;;  %s24_s20 = int_to_ptr.vmem [resolvable:$true] %s23_s20 }
   0x2   :  { %s293_s21 = scalar_lea.vmem %s24_s20, 64  ;;  %p298_p1 = scmp.lt.s32.totalorder %s24_s20, %s24_s20 }
   0x3   :  { %p294_p0 = scmp.ne.s32.totalorder %s24_s20, %s293_s21  ;;  %p299_p2 = scmp.lt.s32.totalorder %s293_s21, %s293_s21 }
   0x5   :  { %p300_p3 = por %p299_p2, %p298_p1 }
   0x7   :  { %p301_p4 = pnand %p300_p3, %p294_p0 }
   0x9   :  { %304 = shalt.err (!%p301_p4)
}
   0xa   :  { %s331_s22 = smov [#allocation4]  }
   0xb   :  { %26 = dma.vmem_to_smem %s24_s20, 64, %s331_s22, [#allocation6]  }
   0xc   :  { %327 = dma.done.wait [#allocation6], 64  }
   0xd   :  { %328 = vsyncadd [#allocation6], 4294967232 }
   0xe   :  { %47 = sfence }
   0xf   :  { %s267_s23 = sld [smem:[#allocation4 + $0x81]]  ;;  %p59_p5 = scmp.gt.s32.totalorder %s423_s0, 0  ;;  %v379_v0 = vld [vmem:[%s424_s1] sm:$0xff]  ;;  %v384_v1 = vld [vmem:[%s424_s1 + $0x8] sm:$0xff]  ;;  %vm157_vm4 = vcmask 7168   ;;  %vm219_vm8 = vcmask 48128  }
  0x10   :  { %s264_s24 = sld [smem:[#allocation4 + $0x1]]  ;;  %p257_p6 = scmp.lt.s32.totalorder %s423_s0, 7 }
  0x11   :  { %s430_s0 = smov (!%p59_p5, %s423_s0), 0  ;;  %s332_s9 = smov 127  }
  0x12   :  { %s432_s0 = smov (!%p257_p6, %s430_s0), 7  ;;  %s73_s13 = sld [smem:[#allocation4]] }
  0x13   :  { %p63_p7 = scmp.lt.s32.totalorder %s432_s0, 7  ;;  %s266_s14 = sld [smem:[#allocation4 + $0x80]] }
  0x14   :  { %s265_s15 = sld [smem:[#allocation4 + $0x2]]  ;;  %s333_s22 = smov [#allocation7]  }
  0x15   :  { %v107_v2 = vstv %s267_s23  ;;  %s434_s0 = smov (!%p63_p7, %s432_s0), 7  ;;  %s268_s16 = sld [smem:[#allocation4 + $0x82]] }
  0x16   :  { %v108_v3 = vmul.f32 %v107_v2, %v379_v0  ;;  %v88_v4 = vstv %s264_s24  ;;  %v109_v6 = vmul.f32 %v107_v2, %v384_v1  ;;  %s271_s10 = sshll.u32 %s434_s0, 4  ;;  %s242_s23 = sshll.u32 %s333_s22, 4  ;;  %s243_s23 = int_to_ptr.vmem [resolvable:$true] %s242_s23 }
  0x17   :  { %v89_v5 = vmul.f32 %v88_v4, %v379_v0  ;;  %v90_v7 = vmul.f32 %v88_v4, %v384_v1  ;;  %s67_s1 = scalar_lea.vmem %s427_s4, %s271_s10  ;;  %s305_s24 = scalar_lea.vmem %s243_s23, 128 }
  0x18   :  { %112 = vrot.lane.b32.xlu1 %v108_v3, %s332_s9  ;;  %v84_v8 = vld [vmem:[%s67_s1 + $0x8] sm:$0xff]  ;;  %v83_v9 = vld [vmem:[%s67_s1] sm:$0xff]  ;;  %v85_v10 = vstv %s73_s13  ;;  %p306_p8 = scmp.ne.s32.totalorder %s243_s23, %s305_s24  ;;  %p310_p9 = scmp.lt.s32.totalorder %s243_s23, %s243_s23 }
  0x19   :  { %93 = vrot.lane.b32.xlu0 %v89_v5, %s332_s9  ;;  %v104_v11 = vstv %s266_s14  ;;  %v86_v12 = vmul.f32 %v85_v10, %v379_v0  ;;  %v87_v19 = vmul.f32 %v85_v10, %v384_v1  ;;  %v210_v5 = vlaneseq  ;;  %p311_p10 = scmp.lt.s32.totalorder %s305_s24, %s305_s24 }
  0x1a   :  { %v105_v14 = vmul.f32 %v104_v11, %v379_v0  ;;  %v101_v15 = vstv %s265_s15  ;;  %v106_v17 = vmul.f32 %v104_v11, %v384_v1 }
  0x1b   :  { %v120_v25 = vstv %s268_s16  ;;  %v211_v10 = vand.u32 127, %v210_v5  ;;  %p312_p11 = por %p311_p10, %p310_p9 }
  0x1c   :  { %114 = vrot.lane.b32.xlu1 %v109_v6, %s332_s9 }
  0x1d   :  { %95 = vrot.lane.b32.xlu0 %v90_v7, %s332_s9  ;;  %vm212_vm5 = vcmp.lt.s32.totalorder %v211_v10, 2  ;;  %vm213_vm6 = vcmp.eq.s32.totalorder %v211_v10, 3  ;;  %p313_p12 = pnand %p312_p11, %p306_p8 }
  0x1e   :  { %vm214_vm7 = vmor %vm212_vm5, %vm213_vm6 }
  0x20   :  { %129 = vrot.lane.b32.xlu1 %v84_v8, %s332_s9 }
  0x21   :  { %127 = vrot.lane.b32.xlu0 %v83_v9, %s332_s9 }
  0x8a   :  { %v113_v13 = vpop.permute.xlu1 %112 }
  0x8b   :  { %v94_v16 = vpop.permute.xlu0 %93  ;;  %v118_v20 = vadd.f32 %v113_v13, %v105_v14 }
  0x8c   :  { %v99_v18 = vadd.f32 %v94_v16, %v86_v12 }
  0x8d   :  { %v121_v31 = vadd.f32 %v120_v25, %v118_v20 }
  0x8e   :  { %v102_v21 = vadd.f32 %v101_v15, %v99_v18  ;;  %v115_v22 = vpop.permute.xlu1 %114 }
  0x8f   :  { %v119_v23 = vadd.f32 %v115_v22, %v106_v17  ;;  %v96_v24 = vpop.permute.xlu0 %95 }
  0x90   :  { %v100_v26 = vadd.f32 %v96_v24, %v87_v19  ;;  %v123_v28 = vsub.f32 %v102_v21, %v83_v9  ;;  %v82_v9 = vld [vmem:[%s425_s2 + $0x8] sm:$0xff] }
  0x91   :  { %v122_v27 = vadd.f32 %v120_v25, %v119_v23  ;;  %v209_v12 = vsub.f32 %v384_v1, %v82_v9 }
  0x92   :  { %v103_v29 = vadd.f32 %v101_v15, %v100_v26  ;;  %v130_v30 = vpop.permute.xlu1 %129  ;;  %v135_v38 = vmul.f32 %v123_v28, %v123_v28 }
  0x93   :  { %v134_v32 = vsub.f32 %v122_v27, %v130_v30  ;;  %v128_v33 = vpop.permute.xlu0 %127  ;;  %v216_v14 = vmul.f32 %v209_v12, %v209_v12 }
  0x94   :  { %v124_v34 = vsub.f32 %v103_v29, %v84_v8  ;;  %v133_v35 = vsub.f32 %v121_v31, %v128_v33  ;;  %v81_v8 = vld [vmem:[%s425_s2] sm:$0xff] }
  0x95   :  { %v138_v36 = vmul.f32 %v134_v32, %v134_v32  ;;  %v208_v11 = vsub.f32 %v379_v0, %v81_v8  ;;  %v218_v20 = vsel %vm214_vm7, %v216_v14, 0.0 }
  0x96   :  { %v136_v37 = vmul.f32 %v124_v34, %v124_v34  ;;  %v137_v39 = vmul.f32 %v133_v35, %v133_v35  ;;  %v221_v25 = vsel %vm219_vm8, %v218_v20, 0.0 }
  0x97   :  { %v215_v13 = vmul.f32 %v208_v11, %v208_v11 }
  0x98   :  { %v140_v40 = vadd.f32 %v138_v36, %v136_v37  ;;  %v139_v41 = vadd.f32 %v137_v39, %v135_v38 }
  0x99   :  { %v217_v19 = vsel %vm214_vm7, %v215_v13, 0.0 }
  0x9a   :  { %283 = vrsqrt.f32 %v139_v41  ;;  %vm143_vm0 = vcmp.eq.f32.partialorder %v139_v41, inf  ;;  %v146_v45 = vand.u32 2147483648, %v139_v41  ;;  %vm145_vm1 = vcmp.eq.f32.partialorder %v139_v41, 0.0 }
  0x9b   :  { %285 = vrsqrt.f32 %v140_v40  ;;  %vm150_vm2 = vcmp.eq.f32.partialorder %v140_v40, inf  ;;  %v153_v48 = vand.u32 2147483648, %v140_v40  ;;  %vm152_vm3 = vcmp.eq.f32.partialorder %v140_v40, 0.0 }
  0x9c   :  { %v220_v24 = vsel %vm219_vm8, %v217_v19, 0.0 }
  0x9d   :  { %v222_v27 = vadd.f32 %v221_v25, %v220_v24 }
  0xa4   :  { %v284_v42 = vpop.eup %283 }
  0xa5   :  { %v286_v43 = vpop.eup %285  ;;  %v142_v44 = vmul.f32 %v284_v42, %v139_v41 }
  0xa6   :  { %v149_v46 = vmul.f32 %v286_v43, %v140_v40 }
  0xa7   :  { %v144_v47 = vsel %vm143_vm0, %v139_v41, %v142_v44 }
  0xa8   :  { %v147_v49 = vsel %vm145_vm1, %v146_v45, %v144_v47  ;;  %v151_v50 = vsel %vm150_vm2, %v140_v40, %v149_v46 }
  0xa9   :  { %v154_v51 = vsel %vm152_vm3, %v153_v48, %v151_v50  ;;  %v155_v52 = vsub.f32 0.0, %v147_v49 }
  0xaa   :  { %v156_v53 = vsub.f32 0.0, %v154_v51 }
  0xab   :  { %v158_v54 = vsel %vm157_vm4, %v155_v52, -inf }
  0xac   :  { %v159_v55 = vsel %vm157_vm4, %v156_v53, -inf }
  0xad   :  { %v160_v56 = vmax.f32 %v158_v54, %v159_v55 }
  0xaf   :  { %161 = vmax.xlane.f32.xlu0 %v160_v56 }
 0x13c   :  { %v162_v57 = vpop.xlane.xlu0 %161 }
 0x13d   :  { %v163_v58 = vrot.slane %v162_v57, 4 }
 0x13f   :  { %v164_v59 = vmax.f32 %v162_v57, %v163_v58 }
 0x141   :  { %v165_v60 = vrot.slane %v164_v59, 2 }
 0x143   :  { %v166_v61 = vmax.f32 %v164_v59, %v165_v60 }
 0x145   :  { %v167_v62 = vrot.slane %v166_v61, 1 }
 0x147   :  { %v168_v63 = vmax.f32 %v166_v61, %v167_v62 }
 0x149   :  { %272 = vpush %v168_v63 }
 0x17a   :  { %s273_s0 = spop %272 }
 0x17b   :  { %v170_v2 = vstv %s273_s0 }
 0x17c   :  { %v171_v3 = vsub.f32 %v155_v52, %v170_v2  ;;  %v172_v4 = vsub.f32 %v156_v53, %v170_v2 }
 0x17e   :  { %v173_v6 = vmul.f32 1.442695, %v171_v3  ;;  %v175_v7 = vmul.f32 1.442695, %v172_v4 }
 0x180   :  { %287 = vpow2.f32 %v173_v6 }
 0x181   :  { %289 = vpow2.f32 %v175_v7 }
 0x18a   :  { %v288_v15 = vpop.eup %287 }
 0x18b   :  { %v290_v16 = vpop.eup %289  ;;  %v177_v17 = vsel %vm157_vm4, %v288_v15, 0.0  ;;  %v190_v18 = vmul.f32 %v288_v15, %v139_v41 }
 0x18c   :  { %v178_v21 = vsel %vm157_vm4, %v290_v16, 0.0  ;;  %v191_v22 = vmul.f32 %v290_v16, %v140_v40 }
 0x18d   :  { %v179_v23 = vadd.f32 %v178_v21, %v177_v17  ;;  %v192_v0 = vsel %vm157_vm4, %v190_v18, 0.0 }
 0x18e   :  { %v193_v1 = vsel %vm157_vm4, %v191_v22, 0.0 }
 0x18f   :  { %180 = vadd.xlane.f32.xlu1 %v179_v23  ;;  %v194_v26 = vadd.f32 %v193_v1, %v192_v0 }
 0x191   :  { %195 = vadd.xlane.f32.xlu0 %v194_v26 }
 0x195   :  { %223 = vadd.xlane.f32.xlu0 %v222_v27 }
 0x21c   :  { %v181_v28 = vpop.xlane.xlu1 %180 }
 0x21d   :  { %v182_v29 = vrot.slane %v181_v28, 4 }
 0x21e   :  { %v196_v30 = vpop.xlane.xlu0 %195 }
 0x21f   :  { %v183_v31 = vadd.f32 %v182_v29, %v181_v28  ;;  %v197_v32 = vrot.slane %v196_v30, 4 }
 0x221   :  { %v184_v33 = vrot.slane %v183_v31, 2  ;;  %v198_v34 = vadd.f32 %v197_v32, %v196_v30 }
 0x222   :  { %v224_v35 = vpop.xlane.xlu0 %223 }
 0x223   :  { %v185_v36 = vadd.f32 %v184_v33, %v183_v31  ;;  %v199_v37 = vrot.slane %v198_v34, 2  ;;  %v225_v38 = vrot.slane %v224_v35, 4 }
 0x225   :  { %v226_v39 = vadd.f32 %v225_v38, %v224_v35  ;;  %v186_v40 = vrot.slane %v185_v36, 1  ;;  %v200_v41 = vadd.f32 %v199_v37, %v198_v34 }
 0x227   :  { %v227_v42 = vrot.slane %v226_v39, 2  ;;  %v187_v43 = vadd.f32 %v186_v40, %v185_v36  ;;  %v201_v44 = vrot.slane %v200_v41, 1 }
 0x229   :  { %v228_v45 = vadd.f32 %v227_v42, %v226_v39  ;;  %274 = vpush %v187_v43  ;;  %v202_v46 = vadd.f32 %v201_v44, %v200_v41 }
 0x22b   :  { %276 = vpush %v202_v46  ;;  %v229_v47 = vrot.slane %v228_v45, 1 }
 0x22d   :  { %v230_v48 = vadd.f32 %v229_v47, %v228_v45 }
 0x22f   :  { %278 = vpush %v230_v48 }
 0x25a   :  { %s275_s2 = spop %274 }
 0x25b   :  { %v189_v49 = vstv %s275_s2 }
 0x25c   :  { %291 = vrcp.f32 %v189_v49  ;;  %s277_s20 = spop %276 }
 0x25d   :  { %v204_v51 = vstv %s277_s20 }
 0x260   :  { %s279_s21 = spop %278 }
 0x261   :  { %v232_v52 = vstv %s279_s21 }
 0x262   :  { %v233_v55 = vmul.f32 0.5, %v232_v52 }
 0x266   :  { %v292_v50 = vpop.eup %291 }
 0x267   :  { %v206_v53 = vmul.f32 %v292_v50, %v204_v51 }
 0x269   :  { %v207_v54 = vsub.f32 0.0, %v206_v53 }
 0x26b   :  { %v234_v56 = vadd.f32 %v233_v55, %v207_v54 }
 0x26d   :  { %235 = vst [vmem:[#allocation7] sm:$0xff] %v234_v56 }
 0x26e   :  { %316 = shalt.err (!%p313_p12)
}
 0x26f   :  { %s317_s3 = scalar_lea.hbm %s428_s5, 128 }
 0x270   :  { %p318_p13 = scmp.ne.s32.totalorder %s428_s5, %s317_s3  ;;  %p321_p0 = scmp.lt.u32.totalorder %s317_s3, %s428_s5 }
 0x272   :  { %p323_p1 = pnand %p321_p0, %p318_p13 }
 0x274   :  { %326 = shalt.err (!%p323_p1)
}
 0x275   :  { %245 = dma.vmem_to_hbm [thread:$0]  %s243_s23, 128, %s428_s5, [#allocation5]  }
 0x276   :  { %329 = dma.done.wait [#allocation5], 128  }
 0x277   :  { %330 = vsyncadd [#allocation5], 4294967168 }
 0x278   :  { %249 = vsyncpa [#allocation5], 1 }
 0x279   :  { %250 = vsyncpa [#allocation6], 1 }

</bundles_post_ra>
